<compile_context>
chip_gen: v6e
topology: v6e:2x2x1
jax: 0.10.0
libtpu: 0.0.40
codegen_flags: <defaults>
</compile_context>

<pallas_src>
import functools

import jax
import jax.numpy as jnp
from jax.experimental import pallas as pl
from jax.experimental.pallas import tpu as pltpu


def _gcn_kernel(B, S, h2d_ref, adj_ref, wT_ref, b_ref, out2d_ref):
    """Fused GCN forward.

    h2d_ref:   (B*S, H)  stacked hidden states
    adj_ref:   (B, S, S) dense adjacency
    wT_ref:    (H, H)    == W^T (pre-transposed in the wrapper)
    b_ref:     (1, H)    bias
    out2d_ref: (B*S, H)  stacked output
    """
    h2d = h2d_ref[...]                                     # (B*S, H)
    wT = wT_ref[...]                                       # (H, H)
    bias = b_ref[...]                                      # (1, H)

    # Single batched projection on the MXU: (B*S, H) @ (H, H) + b.
    proj = jnp.dot(h2d, wT, preferred_element_type=jnp.float32) + bias

    # Per-batch aggregation + ReLU + residual, written straight into
    # sublane-aligned row blocks of the 2-D output (S == 8 keeps slices tiled).
    for b in range(B):                                     # static, unrolled (B tiny)
        lo, hi = b * S, (b + 1) * S
        agg = jnp.dot(adj_ref[b], proj[lo:hi, :],
                      preferred_element_type=jnp.float32)  # (S, H)
        out2d_ref[lo:hi, :] = jnp.maximum(agg, 0.0) + h2d_ref[lo:hi, :]


@jax.jit
def gcn_forward(hidden_state, adjacent_matrix, weight, bias):
    """hidden_state: [B, S, H]; adjacent_matrix: [B, S, S];
    weight: [H, H] (torch Linear layout: (out_features, in_features)); bias: [H]."""
    B, S, H = hidden_state.shape
    wT = weight.T                          # x @ W^T
    b2 = bias.reshape(1, H)
    h2d = hidden_state.reshape(B * S, H)   # free metadata reshape outside the kernel

    out2d = pl.pallas_call(
        functools.partial(_gcn_kernel, B, S),
        out_shape=jax.ShapeDtypeStruct((B * S, H), jnp.float32),
        in_specs=[
            pl.BlockSpec(memory_space=pltpu.MemorySpace.VMEM),  # h2d
            pl.BlockSpec(memory_space=pltpu.MemorySpace.VMEM),  # adj
            pl.BlockSpec(memory_space=pltpu.MemorySpace.VMEM),  # W^T
            pl.BlockSpec(memory_space=pltpu.MemorySpace.VMEM),  # bias
        ],
        out_specs=pl.BlockSpec(memory_space=pltpu.MemorySpace.VMEM),
    )(h2d, adjacent_matrix.astype(jnp.float32), wT, b2)

    return out2d.reshape(B, S, H)


if __name__ == "__main__":
    key = jax.random.PRNGKey(0)
    B, S, H = 2, 8, 32   # batch, seq_len (num graph nodes), hid_size

    ks = jax.random.split(key, 4)
    hidden = jax.random.normal(ks[0], (B, S, H), dtype=jnp.float32)
    # dense 0/1 adjacency matrix
    adj = (jax.random.uniform(ks[1], (B, S, S), dtype=jnp.float32) > 0.5).astype(jnp.float32)

    # deterministic Linear(H, H) parameters (synthetic, torch layout: (out, in))
    bound = 1.0 / (H ** 0.5)
    weight = jax.random.uniform(ks[2], (H, H), minval=-bound, maxval=bound,
                                dtype=jnp.float32)
    bias = jax.random.uniform(ks[3], (H,), minval=-bound, maxval=bound,
                              dtype=jnp.float32)

    out = gcn_forward(hidden, adj, weight, bias)
    out = jax.block_until_ready(out)

    # pure-JAX reference of the PyTorch forward
    ref = jnp.maximum(
        jnp.einsum('bij,bjh->bih', adj, hidden @ weight.T + bias), 0.0) + hidden

    assert out.shape == (B, S, H)
    assert jnp.allclose(out, ref, atol=1e-5, rtol=1e-5), \
        float(jnp.max(jnp.abs(out - ref)))
    print("KERNEL_OK")
</pallas_src>

<mosaic_0001>
module attributes {stable_mosaic.version = 11 : i64} {
  func.func @_gcn_kernel(%arg0: memref<16x32xf32, #tpu.memory_space<vmem>>, %arg1: memref<2x8x8xf32, #tpu.memory_space<vmem>>, %arg2: memref<32x32xf32, #tpu.memory_space<vmem>>, %arg3: memref<1x32xf32, #tpu.memory_space<vmem>>, %arg4: memref<16x32xf32, #tpu.memory_space<vmem>>) attributes {dimension_semantics = [], scalar_prefetch = 0 : i64, scratch_operands = 0 : i64, tpu.core_type = #tpu.core_type<tc>} {
    %c0 = arith.constant 0 : index
    %c0_0 = arith.constant 0 : index
    %0 = vector.load %arg0[%c0, %c0_0] : memref<16x32xf32, #tpu.memory_space<vmem>>, vector<16x32xf32>
    %c0_1 = arith.constant 0 : index
    %c0_2 = arith.constant 0 : index
    %1 = vector.load %arg2[%c0_1, %c0_2] : memref<32x32xf32, #tpu.memory_space<vmem>>, vector<32x32xf32>
    %c0_3 = arith.constant 0 : index
    %c0_4 = arith.constant 0 : index
    %2 = vector.load %arg3[%c0_3, %c0_4] : memref<1x32xf32, #tpu.memory_space<vmem>>, vector<1x32xf32>
    %cst = arith.constant dense<0.000000e+00> : vector<16x32xf32>
    %3 = tpu.matmul %0, %1, %cst {dimension_numbers = #tpu.dot_dimension_numbers<[1], [0], [0], [1], [0, 0, 1, 1], [], []>} : vector<16x32xf32>, vector<32x32xf32>, vector<16x32xf32> -> vector<16x32xf32>
    %4 = vector.broadcast %2 : vector<1x32xf32> to vector<16x32xf32>
    %5 = arith.addf %3, %4 : vector<16x32xf32>
    %c0_5 = arith.constant 0 : index
    %c0_6 = arith.constant 0 : index
    %c0_7 = arith.constant 0 : index
    %6 = vector.load %arg1[%c0_5, %c0_6, %c0_7] : memref<2x8x8xf32, #tpu.memory_space<vmem>>, vector<1x8x8xf32>
    %7 = vector.shape_cast %6 : vector<1x8x8xf32> to vector<8x8xf32>
    %8 = vector.extract_strided_slice %5 {offsets = [0, 0], sizes = [8, 32], strides = [1, 1]} : vector<16x32xf32> to vector<8x32xf32>
    %cst_8 = arith.constant dense<0.000000e+00> : vector<8x32xf32>
    %9 = tpu.matmul %7, %8, %cst_8 {dimension_numbers = #tpu.dot_dimension_numbers<[1], [0], [0], [1], [0, 0, 1, 1], [], []>} : vector<8x8xf32>, vector<8x32xf32>, vector<8x32xf32> -> vector<8x32xf32>
    %cst_9 = arith.constant 0.000000e+00 : f32
    %10 = vector.broadcast %cst_9 : f32 to vector<8x32xf32>
    %11 = arith.maximumf %9, %10 : vector<8x32xf32>
    %c0_10 = arith.constant 0 : index
    %c0_11 = arith.constant 0 : index
    %12 = vector.load %arg0[%c0_10, %c0_11] : memref<16x32xf32, #tpu.memory_space<vmem>>, vector<8x32xf32>
    %13 = arith.addf %11, %12 : vector<8x32xf32>
    %c0_12 = arith.constant 0 : index
    %c0_13 = arith.constant 0 : index
    %14 = vector.load %arg4[%c0_12, %c0_13] : memref<16x32xf32, #tpu.memory_space<vmem>>, vector<8x32xf32>
    tpu.vector_store %arg4[%c0_12, %c0_13], %13 {strides = array<i32>} : memref<16x32xf32, #tpu.memory_space<vmem>>, vector<8x32xf32>,
    %c1 = arith.constant 1 : index
    %c0_14 = arith.constant 0 : index
    %c0_15 = arith.constant 0 : index
    %15 = vector.load %arg1[%c1, %c0_14, %c0_15] : memref<2x8x8xf32, #tpu.memory_space<vmem>>, vector<1x8x8xf32>
    %16 = vector.shape_cast %15 : vector<1x8x8xf32> to vector<8x8xf32>
    %17 = vector.extract_strided_slice %5 {offsets = [8, 0], sizes = [8, 32], strides = [1, 1]} : vector<16x32xf32> to vector<8x32xf32>
    %cst_16 = arith.constant dense<0.000000e+00> : vector<8x32xf32>
    %18 = tpu.matmul %16, %17, %cst_16 {dimension_numbers = #tpu.dot_dimension_numbers<[1], [0], [0], [1], [0, 0, 1, 1], [], []>} : vector<8x8xf32>, vector<8x32xf32>, vector<8x32xf32> -> vector<8x32xf32>
    %cst_17 = arith.constant 0.000000e+00 : f32
    %19 = vector.broadcast %cst_17 : f32 to vector<8x32xf32>
    %20 = arith.maximumf %18, %19 : vector<8x32xf32>
    %c8 = arith.constant 8 : index
    %c0_18 = arith.constant 0 : index
    %21 = vector.load %arg0[%c8, %c0_18] : memref<16x32xf32, #tpu.memory_space<vmem>>, vector<8x32xf32>
    %22 = arith.addf %20, %21 : vector<8x32xf32>
    %c8_19 = arith.constant 8 : index
    %c0_20 = arith.constant 0 : index
    %23 = vector.load %arg4[%c8_19, %c0_20] : memref<16x32xf32, #tpu.memory_space<vmem>>, vector<8x32xf32>
    tpu.vector_store %arg4[%c8_19, %c0_20], %22 {strides = array<i32>} : memref<16x32xf32, #tpu.memory_space<vmem>>, vector<8x32xf32>,
    return
  }
}

</mosaic_0001>

<bundles_post_ra>
// kernel: gcn_forward.1
= control target key start
LH: loop header
LB: loop body
LE: loop exit
PB: predicated region body
PF: predicated region fallthrough
CT: control target
= control target key end

     0   :  { %vm31_vm0 = vcmask 261120   ;;  %s415_s0 = inlined_call_operand.vmem [shape: f32[16,32], index: 0, kind: input, shape index: {}]   ;;  %s416_s1 = inlined_call_operand.vmem [shape: f32[2,8,8], index: 1, kind: input, shape index: {}]   ;;  %s417_s2 = inlined_call_operand.vmem [shape: f32[32,32], index: 2, kind: input, shape index: {}]   ;;  %s418_s3 = inlined_call_operand.vmem [shape: f32[1,32], index: 3, kind: input, shape index: {}]   ;;  %s419_s4 = inlined_call_operand.hbm [shape: f32[16,32], index: 4, kind: output, shape index: {}]  }
   0x1   :  { %v23_v0 = vld [vmem:[%s417_s2 + $0x18] sm:$0xff]  ;;  %v22_v1 = vld [vmem:[%s417_s2 + $0x10] sm:$0xff]  ;;  %v18_v2 = vld [vmem:[%s415_s0] sm:$0xff] }
   0x2   :  { %303 = vmatprep.subr.mxu0 %v23_v0  ;;  %v21_v3 = vld [vmem:[%s417_s2 + $0x8] sm:$0xff]  ;;  %311 = vmatprep.mubr.msk.f32.mxu0 %vm31_vm0, %v18_v2 }
   0x3   :  { %304 = vmatpush3.msra.mxu0 %v23_v0 }
   0x4   :  { %9 = vsyncpa [#allocation3], 0  ;;  %305 = vmatprep.subr.mxu0 %v22_v1  ;;  %v20_v4 = vld [vmem:[%s417_s2] sm:$0xff]  ;;  %v19_v5 = vld [vmem:[%s415_s0 + $0x8] sm:$0xff]  ;;  %v351_v6 = vmov 0.0   ;;  %vm352_vm1 = vmmov 0  }
   0x5   :  { %306 = vmatpush3.msra.mxu0 %v22_v1  ;;  %314 = vmatprep.subr.mxu1 %v351_v6  ;;  %v287_v8 = vld [vmem:[%s418_s3] ss:$0 sm:$0xff]  ;;  %vm114_vm2 = vcmask 64512   ;;  %v291_v13 = vld [vmem:[%s416_s1 + $0x8] sm:$0xff]  ;;  %s353_s3 = smov [#allocation2]  }
   0x6   :  { %307 = vmatprep.subr.mxu0 %v21_v3  ;;  %316 = vmatprep.mubr.msk.f32.mxu1 %vm352_vm1, %v351_v6  ;;  %v113_v11 = vld [vmem:[%s416_s1] sm:$0xff]  ;;  %s276_s5 = sshll.u32 %s353_s3, 4  ;;  %s277_s5 = int_to_ptr.vmem [resolvable:$true] %s276_s5 }
   0x7   :  { %308 = vmatpush3.msra.mxu0 %v21_v3  ;;  %s329_s6 = scalar_lea.vmem %s277_s5, 256  ;;  %p334_p1 = scmp.lt.s32.totalorder %s277_s5, %s277_s5 }
   0x8   :  { %309 = vmatprep.subr.mxu0 %v20_v4  ;;  %p330_p0 = scmp.ne.s32.totalorder %s277_s5, %s329_s6  ;;  %p335_p2 = scmp.lt.s32.totalorder %s329_s6, %s329_s6 }
   0x9   :  { %310 = vmatpush3.msra.mxu0 %v20_v4 }
   0xa   :  { %312 = vmatmul.mubr.msk.f32.vlgmr.msra.gmra.mxu0 %vm31_vm0, %v19_v5  ;;  %p336_p3 = por %p335_p2, %p334_p1 }
   0xc   :  { %p337_p4 = pnand %p336_p3, %p330_p0 }
  0xca   :  { %v313_v7 = vpop.f32.mrf.mxu0 }
  0xcb   :  { %v110_v12 = vadd.f32 %v313_v7, %v287_v8 }
  0xcc   :  { %v104_v9 = vpop.f32.mrf.mxu0 }
  0xcd   :  { %v105_v10 = vadd.f32 %v287_v8, %v104_v9 }
  0xcf   :  { %315 = vmatpush3.msra.mxu1 %v105_v10 }
  0xd0   :  { %317 = vmatmul.mubr.msk.f32.vlgmr.msra.gmra.mxu1 %vm114_vm2, %v113_v11  ;;  %319 = vmatprep.subr.mxu1 %v351_v6 }
  0xd1   :  { %320 = vmatpush3.msra.mxu1 %v110_v12  ;;  %321 = vmatprep.mubr.msk.f32.mxu1 %vm352_vm1, %v351_v6 }
  0xd4   :  { %322 = vmatmul.mubr.msk.f32.vlgmr.msra.gmra.mxu1 %vm114_vm2, %v291_v13 }
 0x190   :  { %v184_v14 = vpop.f32.mrf.mxu1 }
 0x191   :  { %v188_v15 = vmax.f32 %v184_v14, 0.0 }
 0x192   :  { %v318_v16 = vpop.f32.mrf.mxu1 }
 0x193   :  { %v190_v17 = vadd.f32 %v188_v15, %v18_v2 }
 0x194   :  { %v263_v18 = vpop.f32.mrf.mxu1 }
 0x195   :  { %191 = vst.msk [vmem:[#allocation2] sm:$0xff] %vm31_vm0, %v190_v17  ;;  %v267_v19 = vmax.f32 %v263_v18, 0.0 }
 0x196   :  { %v323_v20 = vpop.f32.mrf.mxu1 }
 0x197   :  { %v269_v21 = vadd.f32 %v267_v19, %v19_v5 }
 0x199   :  { %270 = vst.msk [vmem:[#allocation2 + $0x8] sm:$0xff] %vm31_vm0, %v269_v21 }
 0x19a   :  { %340 = shalt.err (!%p337_p4)
}
 0x19b   :  { %s354_s1 = smov 128   ;;  %s355_s7 = smov 8  }
 0x19c   :  { %282 = dma.vmem_to_hbm [thread:$0]  %s277_s5, 256, %s419_s4, [#allocation3], %s354_s1, %s354_s1, %s355_s7  }
 0x19d   :  { %349 = dma.done.wait [#allocation3], 256  }
 0x19e   :  { %350 = vsyncadd [#allocation3], 4294967040 }
 0x19f   :  { %286 = vsyncpa [#allocation3], 1 }

</bundles_post_ra>
